<compile_context>
chip_gen: v5e
topology: v5e:2x2
jax: 0.10.0
libtpu: 0.0.40
codegen_flags: <defaults>
</compile_context>

<pallas_src>
import functools

import jax
import jax.numpy as jnp
from jax.experimental import pallas as pl
from jax.experimental.pallas import tpu as pltpu


def _spectral_mul_kernel(x_ref, w_ref, o_ref):
    """One lane-dense 2x2-block complex matmul per retained Fourier mode.

    x_ref : (TM, B,     2*Cin )   [xr | xi]           (mode-major, channel-last)
    w_ref : (TM, 2*Cin, 2*Cout)   [[wr, wi], [-wi, wr]]
    o_ref : (TM, B,     2*Cout)   [out_r | out_i]
    """
    o_ref[...] = jnp.einsum(
        "mbk,mkn->mbn", x_ref[...], w_ref[...],
        preferred_element_type=jnp.float32)


def _vmem_budget():
    """(working-set budget, vmem_limit_bytes), per TPU generation."""
    try:
        cap = pltpu.get_tpu_info().vmem_capacity_bytes
    except Exception:
        cap = 64 * 1024 * 1024                      # conservative fallback
    if cap >= 96 * 1024 * 1024:                     # v5e / v6e: 128 MiB physical
        return 44 * 1024 * 1024, 96 * 1024 * 1024
    return 18 * 1024 * 1024, 48 * 1024 * 1024       # v7x: 64 MiB physical


def _pick_mode_tile(M, B, Cin2, Cout2, budget_bytes):
    """Largest divisor of M whose (8,128)-padded, double-buffered footprint
    fits `budget_bytes`.  Tiling by divisors of M (not 2*M) guarantees an even
    grid step count, balancing v7x's two TensorCores."""
    def rup(x, m):
        return -(-x // m) * m
    per_mode = 4 * (rup(B, 8) * rup(Cin2, 128)          # x tile
                    + rup(Cin2, 8) * rup(Cout2, 128)    # w tile
                    + rup(B, 8) * rup(Cout2, 128))      # out tile
    tm = max(1, min(M, budget_bytes // (2 * per_mode)))  # 2x: double-buffered
    while M % tm != 0:
        tm -= 1
    return tm


def _spectral_mul(x_cat, w_blk):
    """x_cat: f32 (2M, B, 2Cin); w_blk: f32 (2M, 2Cin, 2Cout) -> (2M, B, 2Cout)."""
    M2x, B, Cin2 = x_cat.shape
    Cout2 = w_blk.shape[-1]
    M = M2x // 2

    budget, vmem_limit = _vmem_budget()
    tm = _pick_mode_tile(M, B, Cin2, Cout2, budget)
    grid = (M2x // tm,)                              # even, since tm | M

    # One (B, 2Cin) @ (2Cin, 2Cout) matmul per mode.
    flops = int(M2x * 2 * B * Cin2 * Cout2)
    bytes_accessed = int(4 * M2x * (B * Cin2 + Cin2 * Cout2 + B * Cout2))

    # TODO(synk): if profiling shows exposed weight DMA (small B), add
    # pipeline_mode=pl.Buffered(3) to the weight BlockSpec; on v5e consider
    # shipping only wr/wi and assembling the 2x2 block in VMEM to cut the
    # binding weight-DMA stream by ~2x.
    return pl.pallas_call(
        _spectral_mul_kernel,
        out_shape=jax.ShapeDtypeStruct((M2x, B, Cout2), jnp.float32),
        grid=grid,
        in_specs=[
            pl.BlockSpec((tm, B, Cin2), lambda i: (i, 0, 0)),
            pl.BlockSpec((tm, Cin2, Cout2), lambda i: (i, 0, 0)),
        ],
        out_specs=pl.BlockSpec((tm, B, Cout2), lambda i: (i, 0, 0)),
        compiler_params=pltpu.CompilerParams(
            dimension_semantics=("parallel",),
            vmem_limit_bytes=vmem_limit,
        ),
        cost_estimate=pl.CostEstimate(
            flops=flops, transcendentals=0, bytes_accessed=bytes_accessed),
    )(x_cat, w_blk)


def prepare_spectral_weights(weights1, weights2):
    """Complex (Cin,Cout,M1,M2) x2 -> real 2x2-block (2*M1*M2, 2*Cin, 2*Cout).

    For inference with static weights, call this once and reuse the result
    (it is otherwise re-derived inside every jitted forward call)."""
    Cin, Cout, M1, M2 = weights1.shape
    wb = jnp.stack([weights1, weights2], axis=0)                  # (2,Cin,Cout,M1,M2)
    wb = jnp.transpose(wb, (0, 3, 4, 1, 2)).reshape(2 * M1 * M2, Cin, Cout)
    wr = jnp.real(wb).astype(jnp.float32)
    wi = jnp.imag(wb).astype(jnp.float32)
    return jnp.concatenate(
        [jnp.concatenate([wr, wi], axis=-1),
         jnp.concatenate([-wi, wr], axis=-1)], axis=-2)           # (2M,2Cin,2Cout)


def init_spectral_conv2d_params(key, in_channels, out_channels, modes1, modes2):
    """Deterministic init matching scale * torch.rand(..., dtype=cfloat)."""
    scale = 1.0 / (in_channels * out_channels)
    k1r, k1i, k2r, k2i = jax.random.split(key, 4)
    shape = (in_channels, out_channels, modes1, modes2)
    w1 = scale * jax.lax.complex(
        jax.random.uniform(k1r, shape, jnp.float32),
        jax.random.uniform(k1i, shape, jnp.float32),
    )
    w2 = scale * jax.lax.complex(
        jax.random.uniform(k2r, shape, jnp.float32),
        jax.random.uniform(k2i, shape, jnp.float32),
    )
    return w1, w2


@functools.partial(jax.jit, static_argnames=("modes1", "modes2"))
def spectral_conv2d_fast(x, weights1, weights2, *, modes1, modes2):
    """Forward pass of SpectralConv2d_fast. x: float32 (B, Cin, H, W)."""
    B, Cin, H, W = x.shape
    Cout = weights1.shape[1]
    Wf = W // 2 + 1
    M1, M2 = modes1, modes2
    M = M1 * M2

    # FFT (no Pallas equivalent; XLA FFT).
    x_ft = jnp.fft.rfft2(x)                                       # (B,Cin,H,Wf) c64

    # Retained-mode slab, mode-major with channels last: (2*M, B, Cin) complex.
    xb = jnp.stack(
        [x_ft[:, :, :M1, :M2], x_ft[:, :, H - M1:, :M2]], axis=0)  # (2,B,Cin,M1,M2)
    xb = jnp.transpose(xb, (0, 3, 4, 1, 2)).reshape(2 * M, B, Cin)
    # TODO(synk): fuse this real/imag de-interleave into the kernel's DMA
    # (complex64 -> f32-pair bitcast with a row-interleaved weight layout) to
    # drop one HBM pass over the mode slab on bandwidth-bound v5e.
    x_cat = jnp.concatenate(
        [jnp.real(xb), jnp.imag(xb)], axis=-1).astype(jnp.float32)  # (2M,B,2Cin)

    w_blk = prepare_spectral_weights(weights1, weights2)            # (2M,2Cin,2Cout)

    out = _spectral_mul(x_cat, w_blk)                               # (2M,B,2Cout)

    out_c = jax.lax.complex(out[..., :Cout], out[..., Cout:])       # (2M,B,Cout)
    out_c = out_c.reshape(2, M1, M2, B, Cout).transpose(0, 3, 4, 1, 2)

    out_ft = jnp.zeros((B, Cout, H, Wf), jnp.complex64)
    out_ft = jax.lax.dynamic_update_slice(out_ft, out_c[0], (0, 0, 0, 0))
    out_ft = jax.lax.dynamic_update_slice(out_ft, out_c[1], (0, 0, H - M1, 0))

    # Inverse FFT back to the spatial domain.
    return jnp.fft.irfft2(out_ft, s=(H, W))


def _reference(x, weights1, weights2, modes1, modes2):
    """Pure-JAX reference mirroring the PyTorch module (f32-exact einsums)."""
    B, Cin, H, W = x.shape
    Cout = weights1.shape[1]
    Wf = W // 2 + 1
    hp = jax.lax.Precision.HIGHEST
    x_ft = jnp.fft.rfft2(x)
    lo = jnp.einsum("bixy,ioxy->boxy", x_ft[:, :, :modes1, :modes2], weights1,
                    precision=hp)
    hi = jnp.einsum("bixy,ioxy->boxy", x_ft[:, :, H - modes1:, :modes2], weights2,
                    precision=hp)
    out_ft = jnp.zeros((B, Cout, H, Wf), jnp.complex64)
    out_ft = out_ft.at[:, :, :modes1, :modes2].set(lo)
    out_ft = out_ft.at[:, :, H - modes1:, :modes2].set(hi)
    return jnp.fft.irfft2(out_ft, s=(H, W))


if __name__ == "__main__":
    B, Cin, Cout, H, W = 2, 4, 8, 16, 16
    modes1, modes2 = 6, 6

    key = jax.random.PRNGKey(0)
    kx, kw = jax.random.split(key)
    x = jax.random.normal(kx, (B, Cin, H, W), jnp.float32)
    w1, w2 = init_spectral_conv2d_params(kw, Cin, Cout, modes1, modes2)

    out = spectral_conv2d_fast(x, w1, w2, modes1=modes1, modes2=modes2)
    out = jax.block_until_ready(out)

    ref = _reference(x, w1, w2, modes1, modes2)
    assert out.shape == (B, Cout, H, W)
    # Kernel matmuls use default MXU precision (bf16 passes, f32 accumulate);
    # the reference is computed at Precision.HIGHEST, so allow bf16-level error.
    assert jnp.allclose(out, ref, atol=1e-3, rtol=1e-3), "mismatch vs reference"

    print("KERNEL_OK")
</pallas_src>

<mosaic_0001>
module attributes {stable_mosaic.version = 11 : i64} {
  func.func @_spectral_mul_kernel(%arg0: i32, %arg1: memref<36x2x8xf32, #tpu.memory_space<vmem>>, %arg2: memref<36x8x16xf32, #tpu.memory_space<vmem>>, %arg3: memref<36x2x16xf32, #tpu.memory_space<vmem>>) attributes {dimension_semantics = [#tpu.dimension_semantics<parallel>], iteration_bounds = array<i64: 2>, scalar_prefetch = 0 : i64, scratch_operands = 0 : i64, tpu.core_type = #tpu.core_type<tc>, window_params = [{transform_indices = @transform_0, window_bounds = array<i64: 36, 2, 8>}, {transform_indices = @transform_1, window_bounds = array<i64: 36, 8, 16>}, {transform_indices = @transform_2, window_bounds = array<i64: 36, 2, 16>}]} {
    %c0 = arith.constant 0 : index
    %c0_0 = arith.constant 0 : index
    %c0_1 = arith.constant 0 : index
    %0 = vector.load %arg1[%c0, %c0_0, %c0_1] : memref<36x2x8xf32, #tpu.memory_space<vmem>>, vector<36x2x8xf32>
    %c0_2 = arith.constant 0 : index
    %c0_3 = arith.constant 0 : index
    %c0_4 = arith.constant 0 : index
    %1 = vector.load %arg2[%c0_2, %c0_3, %c0_4] : memref<36x8x16xf32, #tpu.memory_space<vmem>>, vector<36x8x16xf32>
    "tpu.trace_start"() <{level = 10 : i32, message = "mbk,mkn->mbn"}> : () -> ()
    %cst = arith.constant dense<0.000000e+00> : vector<36x2x16xf32>
    %2 = tpu.matmul %0, %1, %cst {dimension_numbers = #tpu.dot_dimension_numbers<[2], [1], [1], [2], [0, 0, 0, 1, 1, 2], [0], [0]>} : vector<36x2x8xf32>, vector<36x8x16xf32>, vector<36x2x16xf32> -> vector<36x2x16xf32>
    "tpu.trace_stop"() : () -> ()
    %c0_5 = arith.constant 0 : index
    %c0_6 = arith.constant 0 : index
    %c0_7 = arith.constant 0 : index
    %3 = vector.load %arg3[%c0_5, %c0_6, %c0_7] : memref<36x2x16xf32, #tpu.memory_space<vmem>>, vector<36x2x16xf32>
    tpu.vector_store %arg3[%c0_5, %c0_6, %c0_7], %2 {strides = array<i32>} : memref<36x2x16xf32, #tpu.memory_space<vmem>>, vector<36x2x16xf32>,
    return
  }
  func.func @transform_0(%arg0: i32) -> (i32, i32, i32) {
    %c0_i32 = arith.constant 0 : i32
    %c0_i32_0 = arith.constant 0 : i32
    %c0_i32_1 = arith.constant 0 : i32
    return %arg0, %c0_i32, %c0_i32_0 : i32, i32, i32
  }
  func.func @transform_1(%arg0: i32) -> (i32, i32, i32) {
    %c0_i32 = arith.constant 0 : i32
    %c0_i32_0 = arith.constant 0 : i32
    %c0_i32_1 = arith.constant 0 : i32
    return %arg0, %c0_i32, %c0_i32_0 : i32, i32, i32
  }
  func.func @transform_2(%arg0: i32) -> (i32, i32, i32) {
    %c0_i32 = arith.constant 0 : i32
    %c0_i32_0 = arith.constant 0 : i32
    %c0_i32_1 = arith.constant 0 : i32
    return %arg0, %c0_i32, %c0_i32_0 : i32, i32, i32
  }
}

</mosaic_0001>

<bundles_post_ra>
// kernel: custom-call.1
= control target key start
LH: loop header
LB: loop body
LE: loop exit
PB: predicated region body
PF: predicated region fallthrough
CT: control target
= control target key end

     0   :  { %s56_s0 = inlined_call_operand.hbm [shape: c64[4,8,6,6], index: 0, kind: input, shape index: {}]   ;;  %s57_s1 = inlined_call_operand.vmem [shape: f32[4,8,6,6], index: 1, kind: output, shape index: {}]  }
   0x1   :  { %s2_s8 = scalar_lea.hbm %s56_s0, 144 }
   0x2   :  { %3 = vsyncpa [#allocation0], 0  ;;  %s5_s9 = sshll.u32 %s2_s8, 4  ;;  %s7_s12 = sshll.u32 %s57_s1, 4  ;;  %s6_s9 = int_to_ptr.hbm [resolvable:$true] %s5_s9  ;;  %s8_s12 = int_to_ptr.vmem [resolvable:$true] %s7_s12 }
   0x3   :  { %10 = dma.hbm_to_vmem [thread:$0]  %s6_s9, 2304, %s8_s12, [#allocation0] }
   0x4   :  { %38 = dma.done.wait [#allocation0], 2304  }
   0x5   :  { %39 = vsyncadd [#allocation0], 4294964992 }
   0x6   :  { %13 = vsyncpa [#allocation0], 1 }

// kernel: custom-call
= control target key start
LH: loop header
LB: loop body
LE: loop exit
PB: predicated region body
PF: predicated region fallthrough
CT: control target
= control target key end

     0   :  { %2 = vsyncpa [#allocation0], 0  ;;  %s55_s0 = inlined_call_operand.hbm [shape: c64[4,8,6,6], index: 0, kind: input, shape index: {}]   ;;  %s56_s1 = inlined_call_operand.vmem [shape: f32[4,8,6,6], index: 1, kind: output, shape index: {}]  }
   0x1   :  { %s4_s8 = sshll.u32 %s55_s0, 4  ;;  %s6_s11 = sshll.u32 %s56_s1, 4  ;;  %s5_s8 = int_to_ptr.hbm [resolvable:$true] %s4_s8  ;;  %s7_s11 = int_to_ptr.vmem [resolvable:$true] %s6_s11 }
   0x2   :  { %9 = dma.hbm_to_vmem [thread:$0]  %s5_s8, 2304, %s7_s11, [#allocation0] }
   0x3   :  { %37 = dma.done.wait [#allocation0], 2304  }
   0x4   :  { %38 = vsyncadd [#allocation0], 4294964992 }
   0x5   :  { %12 = vsyncpa [#allocation0], 1 }

// kernel: neg.1
= control target key start
LH: loop header
LB: loop body
LE: loop exit
PB: predicated region body
PF: predicated region fallthrough
CT: control target
= control target key end

     0   :  { %s72_s0 = inlined_call_operand.vmem [shape: f32[72,4,8], index: 0, kind: input, shape index: {}]   ;;  %s73_s1 = inlined_call_operand.vmem [shape: f32[72,4,8], index: 1, kind: output, shape index: {}]  }
   0x1   :  { %v2_v0 = vld [vmem:[%s72_s0] sm:$0xff]  ;;  %v32_v1 = vld [vmem:[%s72_s0 + $0x8] sm:$0xff]  ;;  %v34_v2 = vld [vmem:[%s72_s0 + $0x10] sm:$0xff] }
   0x2   :  { %v5_v3 = vxor.u32 2147483648, %v2_v0  ;;  %v12_v4 = vxor.u32 2147483648, %v32_v1  ;;  %v20_v5 = vxor.u32 2147483648, %v34_v2  ;;  %v36_v6 = vld [vmem:[%s72_s0 + $0x18] sm:$0xff] }
   0x3   :  { %v28_v7 = vxor.u32 2147483648, %v36_v6 }
   0x4   :  { %7 = vst [vmem:[%s73_s1] sm:$0xff] %v5_v3 }
   0x5   :  { %33 = vst [vmem:[%s73_s1 + $0x8] sm:$0xff] %v12_v4 }
   0x6   :  { %35 = vst [vmem:[%s73_s1 + $0x10] sm:$0xff] %v20_v5 }
   0x7   :  { %37 = vst [vmem:[%s73_s1 + $0x18] sm:$0xff] %v28_v7 }

// kernel: spectral_conv2d_fast.1
= control target key start
LH: loop header
LB: loop body
LE: loop exit
PB: predicated region body
PF: predicated region fallthrough
CT: control target
= control target key end

     0   :  { %s1252_s9 = smov 0   ;;  %s1466_s0 = inlined_call_operand.vmem [shape: f32[72,2,8], index: 0, kind: input, shape index: {}]   ;;  %s1467_s1 = inlined_call_operand.vmem [shape: f32[72,8,16], index: 1, kind: input, shape index: {}]   ;;  %s1468_s2 = inlined_call_operand.vmem [shape: f32[72,2,16], index: 2, kind: output, shape index: {}]  }
   0x1 LB: > { %s1175_s10 = sadd.s32 4294967295, %s1235_s9   ;;  %p1179_p0 = scmp.ge.s32.totalorder %s1235_s9, 1  ;;  %s1235_s9 = sphi %s1252_s9, %s12_s9  }
   0x2   : > { %p124_p1 = scmp.lt.s32.totalorder %s1235_s9, 3 }
   0x4   : > { %p125_p2 = pnand %p1179_p0, %p124_p1 }
   0x5   : > { %s151_s11 = smul.u32 (!%p125_p2), 36, %s1175_s10 }
   0x6   : > { %128 = sbr.rel (%p125_p2) target bundleno = 214 (0xd6), region = 28 }
   0x7   : > { %p152_p3 = scmp.lt.s32.totalorder (!%p125_p2), %s151_s11, 71 }
   0xb   : > { %s1470_s11 = smov (!%p152_p3, %s151_s11), 71  ;;  %vm241_vm0 = vcmask 64512   ;;  %vm1070_vm1 = vcmask 123904  }
   0xc   : > { %s1181_s12 = sshll.u32 %s1470_s11, 3  ;;  %s1180_s13 = sshll.u32 %s1470_s11, 1 }
   0xd   : > { %s1267_s16 = scalar_lea.vmem %s1467_s1, %s1181_s12  ;;  %s1274_s19 = scalar_lea.vmem %s1466_s0, %s1180_s13 }
   0xe   : > { %v207_v0 = vld [vmem:[%s1267_s16 + $0x10] sm:$0xff]  ;;  %v208_v1 = vld [vmem:[%s1267_s16 + $0x18] sm:$0xff]  ;;  %v171_v2 = vld [vmem:[%s1274_s19 + $0x4] sm:$0x3]  ;;  %s1389_s22 = scalar_lea.vmem %s1468_s2, %s1180_s13 }
   0xf   : > { %306 = vmatpush.msra.mxu2 %v207_v0  ;;  %329 = vmatpush.msra.mxu3 %v208_v1  ;;  %v172_v3 = vld [vmem:[%s1274_s19 + $0x6] sm:$0x3]  ;;  %v211_v4 = vld [vmem:[%s1267_s16 + $0x30] sm:$0xff]  ;;  %v212_v5 = vld [vmem:[%s1267_s16 + $0x38] sm:$0xff] }
  0x10   : > { %1185 = vmatmul.msk.f32.vlgmr.msra.gmra.mxu2 %vm241_vm0, %v171_v2  ;;  %1186 = vmatmul.msk.f32.vlgmr.msra.gmra.mxu3 %vm241_vm0, %v172_v3  ;;  %v205_v6 = vld [vmem:[%s1267_s16] sm:$0xff]  ;;  %v206_v7 = vld [vmem:[%s1267_s16 + $0x8] sm:$0xff]  ;;  %v215_v12 = vld [vmem:[%s1267_s16 + $0x50] sm:$0xff] }
  0x11   : > { %v169_v8 = vld [vmem:[%s1274_s19] sm:$0x3]  ;;  %398 = vmatpush.msrb.mxu2 %v211_v4  ;;  %421 = vmatpush.msrb.mxu3 %v212_v5  ;;  %v170_v9 = vld [vmem:[%s1274_s19 + $0x2] sm:$0x3]  ;;  %v210_v11 = vld [vmem:[%s1267_s16 + $0x28] sm:$0xff] }
  0x12   : > { %v209_v10 = vld [vmem:[%s1267_s16 + $0x20] sm:$0xff]  ;;  %260 = vmatpush.msra.mxu0 %v205_v6  ;;  %283 = vmatpush.msra.mxu1 %v206_v7  ;;  %v216_v13 = vld [vmem:[%s1267_s16 + $0x58] sm:$0xff]  ;;  %v214_v15 = vld [vmem:[%s1267_s16 + $0x48] sm:$0xff] }
  0x13   : > { %1183 = vmatmul.msk.f32.vlgmr.msra.gmra.mxu0 %vm241_vm0, %v169_v8  ;;  %1184 = vmatmul.msk.f32.vlgmr.msra.gmra.mxu1 %vm241_vm0, %v170_v9  ;;  %v213_v14 = vld [vmem:[%s1267_s16 + $0x40] sm:$0xff]  ;;  %v175_v16 = vld [vmem:[%s1274_s19 + $0xc] sm:$0x3]  ;;  %v176_v17 = vld [vmem:[%s1274_s19 + $0xe] sm:$0x3] }
  0x14   : > { %352 = vmatpush.msrb.mxu0 %v209_v10  ;;  %375 = vmatpush.msrb.mxu1 %v210_v11  ;;  %v219_v18 = vld [vmem:[%s1267_s16 + $0x70] sm:$0xff]  ;;  %v220_v19 = vld [vmem:[%s1267_s16 + $0x78] sm:$0xff]  ;;  %v173_v20 = vld [vmem:[%s1274_s19 + $0x8] sm:$0x3] }
  0x15   : > { %490 = vmatpush.msra.mxu2 %v215_v12  ;;  %513 = vmatpush.msra.mxu3 %v216_v13  ;;  %v174_v21 = vld [vmem:[%s1274_s19 + $0xa] sm:$0x3]  ;;  %v217_v22 = vld [vmem:[%s1267_s16 + $0x60] sm:$0xff]  ;;  %v179_v24 = vld [vmem:[%s1274_s19 + $0x14] sm:$0x3] }
  0x16   : > { %444 = vmatpush.msra.mxu0 %v213_v14  ;;  %467 = vmatpush.msra.mxu1 %v214_v15  ;;  %v218_v23 = vld [vmem:[%s1267_s16 + $0x68] sm:$0xff]  ;;  %v180_v25 = vld [vmem:[%s1274_s19 + $0x16] sm:$0x3]  ;;  %v224_v27 = vld [vmem:[%s1267_s16 + $0x98] sm:$0xff] }
  0x17   : > { %v223_v26 = vld [vmem:[%s1267_s16 + $0x90] sm:$0xff]  ;;  %v221_v30 = vld [vmem:[%s1267_s16 + $0x80] sm:$0xff]  ;;  %v222_v31 = vld [vmem:[%s1267_s16 + $0x88] sm:$0xff] }
  0x18   : > { %1189 = vmatmul.msk.f32.vlgmr.msrb.gmra.mxu2 %vm241_vm0, %v175_v16  ;;  %1190 = vmatmul.msk.f32.vlgmr.msrb.gmra.mxu3 %vm241_vm0, %v176_v17  ;;  %v177_v28 = vld [vmem:[%s1274_s19 + $0x10] sm:$0x3]  ;;  %v178_v29 = vld [vmem:[%s1274_s19 + $0x12] sm:$0x3]  ;;  %v183_v32 = vld [vmem:[%s1274_s19 + $0x1c] sm:$0x3] }
  0x19   : > { %582 = vmatpush.msrb.mxu2 %v219_v18  ;;  %605 = vmatpush.msrb.mxu3 %v220_v19  ;;  %v184_v33 = vld [vmem:[%s1274_s19 + $0x1e] sm:$0x3]  ;;  %v227_v34 = vld [vmem:[%s1267_s16 + $0xb0] sm:$0xff]  ;;  %v181_v36 = vld [vmem:[%s1274_s19 + $0x18] sm:$0x3] }
  0x1a   : > { %v228_v35 = vld [vmem:[%s1267_s16 + $0xb8] sm:$0xff]  ;;  %v225_v38 = vld [vmem:[%s1267_s16 + $0xa0] sm:$0xff]  ;;  %v226_v39 = vld [vmem:[%s1267_s16 + $0xa8] sm:$0xff] }
  0x1b   : > { %1187 = vmatmul.msk.f32.vlgmr.msrb.gmra.mxu0 %vm241_vm0, %v173_v20  ;;  %1188 = vmatmul.msk.f32.vlgmr.msrb.gmra.mxu1 %vm241_vm0, %v174_v21  ;;  %v182_v37 = vld [vmem:[%s1274_s19 + $0x1a] sm:$0x3]  ;;  %v187_v40 = vld [vmem:[%s1274_s19 + $0x24] sm:$0x3]  ;;  %v188_v41 = vld [vmem:[%s1274_s19 + $0x26] sm:$0x3] }
  0x1c   : > { %536 = vmatpush.msrb.mxu0 %v217_v22  ;;  %559 = vmatpush.msrb.mxu1 %v218_v23  ;;  %v231_v42 = vld [vmem:[%s1267_s16 + $0xd0] sm:$0xff]  ;;  %v232_v43 = vld [vmem:[%s1267_s16 + $0xd8] sm:$0xff]  ;;  %v185_v44 = vld [vmem:[%s1274_s19 + $0x20] sm:$0x3] }
  0x1d   : > { %v186_v45 = vld [vmem:[%s1274_s19 + $0x22] sm:$0x3]  ;;  %v230_v47 = vld [vmem:[%s1267_s16 + $0xc8] sm:$0xff]  ;;  %v235_v50 = vld [vmem:[%s1267_s16 + $0xf0] sm:$0xff] }
  0x1e   : > { %v229_v46 = vld [vmem:[%s1267_s16 + $0xc0] sm:$0xff]  ;;  %v191_v48 = vld [vmem:[%s1274_s19 + $0x2c] sm:$0x3]  ;;  %v192_v49 = vld [vmem:[%s1274_s19 + $0x2e] sm:$0x3] }
  0x1f   : > { %v236_v51 = vld [vmem:[%s1267_s16 + $0xf8] sm:$0xff]  ;;  %v189_v52 = vld [vmem:[%s1274_s19 + $0x28] sm:$0x3]  ;;  %v190_v53 = vld [vmem:[%s1274_s19 + $0x2a] sm:$0x3] }
  0x20   : > { %1193 = vmatmul.msk.f32.vlgmr.msra.gmra.mxu2 %vm241_vm0, %v179_v24  ;;  %1194 = vmatmul.msk.f32.vlgmr.msra.gmra.mxu3 %vm241_vm0, %v180_v25  ;;  %v233_v54 = vld [vmem:[%s1267_s16 + $0xe0] sm:$0xff]  ;;  %v234_v55 = vld [vmem:[%s1267_s16 + $0xe8] sm:$0xff]  ;;  %v195_v56 = vld [vmem:[%s1274_s19 + $0x34] sm:$0x3] }
  0x21   : > { %674 = vmatpush.msra.mxu2 %v223_v26  ;;  %697 = vmatpush.msra.mxu3 %v224_v27  ;;  %v196_v57 = vld [vmem:[%s1274_s19 + $0x36] sm:$0x3]  ;;  %v240_v59 = vld [vmem:[%s1267_s16 + $0x118] sm:$0xff]  ;;  %v193_v60 = vld [vmem:[%s1274_s19 + $0x30] sm:$0x3] }
  0x22   : > { %v239_v58 = vld [vmem:[%s1267_s16 + $0x110] sm:$0xff]  ;;  %v237_v62 = vld [vmem:[%s1267_s16 + $0x100] sm:$0xff]  ;;  %v238_v63 = vld [vmem:[%s1267_s16 + $0x108] sm:$0xff] }
  0x23   : > { %1191 = vmatmul.msk.f32.vlgmr.msra.gmra.mxu0 %vm241_vm0, %v177_v28  ;;  %1192 = vmatmul.msk.f32.vlgmr.msra.gmra.mxu1 %vm241_vm0, %v178_v29  ;;  %v194_v61 = vld [vmem:[%s1274_s19 + $0x32] sm:$0x3]  ;;  %v199_v0 = vld [vmem:[%s1274_s19 + $0x3c] sm:$0x3]  ;;  %v200_v1 = vld [vmem:[%s1274_s19 + $0x3e] sm:$0x3] }
  0x24   : > { %628 = vmatpush.msra.mxu0 %v221_v30  ;;  %651 = vmatpush.msra.mxu1 %v222_v31  ;;  %v197_v2 = vld [vmem:[%s1274_s19 + $0x38] sm:$0x3]  ;;  %v198_v3 = vld [vmem:[%s1274_s19 + $0x3a] sm:$0x3]  ;;  %v203_v4 = vld [vmem:[%s1274_s19 + $0x44] sm:$0x3] }
  0x25   : > { %v204_v5 = vld [vmem:[%s1274_s19 + $0x46] sm:$0x3]  ;;  %v201_v6 = vld [vmem:[%s1274_s19 + $0x40] sm:$0x3]  ;;  %v202_v7 = vld [vmem:[%s1274_s19 + $0x42] sm:$0x3] }
  0x28   : > { %1197 = vmatmul.msk.f32.vlgmr.msrb.gmra.mxu2 %vm241_vm0, %v183_v32  ;;  %1198 = vmatmul.msk.f32.vlgmr.msrb.gmra.mxu3 %vm241_vm0, %v184_v33 }
  0x29   : > { %766 = vmatpush.msrb.mxu2 %v227_v34  ;;  %789 = vmatpush.msrb.mxu3 %v228_v35 }
  0x2b   : > { %1195 = vmatmul.msk.f32.vlgmr.msrb.gmra.mxu0 %vm241_vm0, %v181_v36  ;;  %1196 = vmatmul.msk.f32.vlgmr.msrb.gmra.mxu1 %vm241_vm0, %v182_v37 }
  0x2c   : > { %720 = vmatpush.msrb.mxu0 %v225_v38  ;;  %743 = vmatpush.msrb.mxu1 %v226_v39 }
  0x30   : > { %1201 = vmatmul.msk.f32.vlgmr.msra.gmra.mxu2 %vm241_vm0, %v187_v40  ;;  %1202 = vmatmul.msk.f32.vlgmr.msra.gmra.mxu3 %vm241_vm0, %v188_v41 }
  0x31   : > { %858 = vmatpush.msra.mxu2 %v231_v42  ;;  %881 = vmatpush.msra.mxu3 %v232_v43 }
  0x33   : > { %1199 = vmatmul.msk.f32.vlgmr.msra.gmra.mxu0 %vm241_vm0, %v185_v44  ;;  %1200 = vmatmul.msk.f32.vlgmr.msra.gmra.mxu1 %vm241_vm0, %v186_v45 }
  0x34   : > { %812 = vmatpush.msra.mxu0 %v229_v46  ;;  %835 = vmatpush.msra.mxu1 %v230_v47 }
  0x38   : > { %1205 = vmatmul.msk.f32.vlgmr.msrb.gmra.mxu2 %vm241_vm0, %v191_v48  ;;  %1206 = vmatmul.msk.f32.vlgmr.msrb.gmra.mxu3 %vm241_vm0, %v192_v49 }
  0x39   : > { %950 = vmatpush.msrb.mxu2 %v235_v50  ;;  %973 = vmatpush.msrb.mxu3 %v236_v51 }
  0x3b   : > { %1203 = vmatmul.msk.f32.vlgmr.msrb.gmra.mxu0 %vm241_vm0, %v189_v52  ;;  %1204 = vmatmul.msk.f32.vlgmr.msrb.gmra.mxu1 %vm241_vm0, %v190_v53 }
  0x3c   : > { %904 = vmatpush.msrb.mxu0 %v233_v54  ;;  %927 = vmatpush.msrb.mxu1 %v234_v55 }
  0x40   : > { %1209 = vmatmul.msk.f32.vlgmr.msra.gmra.mxu2 %vm241_vm0, %v195_v56  ;;  %1210 = vmatmul.msk.f32.vlgmr.msra.gmra.mxu3 %vm241_vm0, %v196_v57 }
  0x41   : > { %1042 = vmatpush.msra.mxu2 %v239_v58  ;;  %1065 = vmatpush.msra.mxu3 %v240_v59 }
  0x43   : > { %1207 = vmatmul.msk.f32.vlgmr.msra.gmra.mxu0 %vm241_vm0, %v193_v60  ;;  %1208 = vmatmul.msk.f32.vlgmr.msra.gmra.mxu1 %vm241_vm0, %v194_v61 }
  0x44   : > { %996 = vmatpush.msra.mxu0 %v237_v62  ;;  %1019 = vmatpush.msra.mxu1 %v238_v63 }
  0x48   : > { %1213 = vmatmul.msk.f32.vlgmr.msrb.gmra.mxu2 %vm241_vm0, %v199_v0  ;;  %1214 = vmatmul.msk.f32.vlgmr.msrb.gmra.mxu3 %vm241_vm0, %v200_v1 }
  0x4b   : > { %1211 = vmatmul.msk.f32.vlgmr.msrb.gmra.mxu0 %vm241_vm0, %v197_v2  ;;  %1212 = vmatmul.msk.f32.vlgmr.msrb.gmra.mxu1 %vm241_vm0, %v198_v3 }
  0x50   : > { %1217 = vmatmul.msk.f32.vlgmr.msra.gmra.mxu2 %vm241_vm0, %v203_v4  ;;  %1218 = vmatmul.msk.f32.vlgmr.msra.gmra.mxu3 %vm241_vm0, %v204_v5 }
  0x53   : > { %1215 = vmatmul.msk.f32.vlgmr.msra.gmra.mxu0 %vm241_vm0, %v201_v6  ;;  %1216 = vmatmul.msk.f32.vlgmr.msra.gmra.mxu1 %vm241_vm0, %v202_v7 }
  0x90   : > { %v262_v8 = vpop.f32.mrf.mxu0  ;;  %v285_v9 = vpop.f32.mrf.mxu1 }
  0x91   : > { %1071 = vst.msk [vmem:[%s1389_s22] sm:$0x3] %vm1070_vm1, %v262_v8 }
  0x92   : > { %1072 = vst.msk [vmem:[%s1389_s22 + $0x2] sm:$0x3] %vm1070_vm1, %v285_v9 }
  0x93   : > { %v308_v10 = vpop.f32.mrf.mxu2  ;;  %v331_v11 = vpop.f32.mrf.mxu3 }
  0x94   : > { %1073 = vst.msk [vmem:[%s1389_s22 + $0x4] sm:$0x3] %vm1070_vm1, %v308_v10 }
  0x95   : > { %1074 = vst.msk [vmem:[%s1389_s22 + $0x6] sm:$0x3] %vm1070_vm1, %v331_v11 }
  0x98   : > { %v354_v12 = vpop.f32.mrf.mxu0  ;;  %v377_v13 = vpop.f32.mrf.mxu1 }
  0x99   : > { %1075 = vst.msk [vmem:[%s1389_s22 + $0x8] sm:$0x3] %vm1070_vm1, %v354_v12 }
  0x9a   : > { %1076 = vst.msk [vmem:[%s1389_s22 + $0xa] sm:$0x3] %vm1070_vm1, %v377_v13 }
  0x9b   : > { %v400_v14 = vpop.f32.mrf.mxu2  ;;  %v423_v15 = vpop.f32.mrf.mxu3 }
  0x9c   : > { %1077 = vst.msk [vmem:[%s1389_s22 + $0xc] sm:$0x3] %vm1070_vm1, %v400_v14 }
  0x9d   : > { %1078 = vst.msk [vmem:[%s1389_s22 + $0xe] sm:$0x3] %vm1070_vm1, %v423_v15 }
  0xa0   : > { %v446_v16 = vpop.f32.mrf.mxu0  ;;  %v469_v17 = vpop.f32.mrf.mxu1 }
  0xa1   : > { %1079 = vst.msk [vmem:[%s1389_s22 + $0x10] sm:$0x3] %vm1070_vm1, %v446_v16 }
  0xa2   : > { %1080 = vst.msk [vmem:[%s1389_s22 + $0x12] sm:$0x3] %vm1070_vm1, %v469_v17 }
  0xa3   : > { %v492_v18 = vpop.f32.mrf.mxu2  ;;  %v515_v19 = vpop.f32.mrf.mxu3 }
  0xa4   : > { %1081 = vst.msk [vmem:[%s1389_s22 + $0x14] sm:$0x3] %vm1070_vm1, %v492_v18 }
  0xa5   : > { %1082 = vst.msk [vmem:[%s1389_s22 + $0x16] sm:$0x3] %vm1070_vm1, %v515_v19 }
  0xa8   : > { %v538_v20 = vpop.f32.mrf.mxu0  ;;  %v561_v21 = vpop.f32.mrf.mxu1 }
  0xa9   : > { %1083 = vst.msk [vmem:[%s1389_s22 + $0x18] sm:$0x3] %vm1070_vm1, %v538_v20 }
  0xaa   : > { %1084 = vst.msk [vmem:[%s1389_s22 + $0x1a] sm:$0x3] %vm1070_vm1, %v561_v21 }
  0xab   : > { %v584_v22 = vpop.f32.mrf.mxu2  ;;  %v607_v23 = vpop.f32.mrf.mxu3 }
  0xac   : > { %1085 = vst.msk [vmem:[%s1389_s22 + $0x1c] sm:$0x3] %vm1070_vm1, %v584_v22 }
  0xad   : > { %1086 = vst.msk [vmem:[%s1389_s22 + $0x1e] sm:$0x3] %vm1070_vm1, %v607_v23 }
  0xb0   : > { %v630_v24 = vpop.f32.mrf.mxu0  ;;  %v653_v25 = vpop.f32.mrf.mxu1 }
  0xb1   : > { %1087 = vst.msk [vmem:[%s1389_s22 + $0x20] sm:$0x3] %vm1070_vm1, %v630_v24 }
  0xb2   : > { %1088 = vst.msk [vmem:[%s1389_s22 + $0x22] sm:$0x3] %vm1070_vm1, %v653_v25 }
  0xb3   : > { %v676_v26 = vpop.f32.mrf.mxu2  ;;  %v699_v27 = vpop.f32.mrf.mxu3 }
  0xb4   : > { %1089 = vst.msk [vmem:[%s1389_s22 + $0x24] sm:$0x3] %vm1070_vm1, %v676_v26 }
  0xb5   : > { %1090 = vst.msk [vmem:[%s1389_s22 + $0x26] sm:$0x3] %vm1070_vm1, %v699_v27 }
  0xb8   : > { %v722_v28 = vpop.f32.mrf.mxu0  ;;  %v745_v29 = vpop.f32.mrf.mxu1 }
  0xb9   : > { %1091 = vst.msk [vmem:[%s1389_s22 + $0x28] sm:$0x3] %vm1070_vm1, %v722_v28 }
  0xba   : > { %1092 = vst.msk [vmem:[%s1389_s22 + $0x2a] sm:$0x3] %vm1070_vm1, %v745_v29 }
  0xbb   : > { %v768_v30 = vpop.f32.mrf.mxu2  ;;  %v791_v31 = vpop.f32.mrf.mxu3 }
  0xbc   : > { %1093 = vst.msk [vmem:[%s1389_s22 + $0x2c] sm:$0x3] %vm1070_vm1, %v768_v30 }
  0xbd   : > { %1094 = vst.msk [vmem:[%s1389_s22 + $0x2e] sm:$0x3] %vm1070_vm1, %v791_v31 }
  0xc0   : > { %v814_v32 = vpop.f32.mrf.mxu0  ;;  %v837_v33 = vpop.f32.mrf.mxu1 }
  0xc1   : > { %1095 = vst.msk [vmem:[%s1389_s22 + $0x30] sm:$0x3] %vm1070_vm1, %v814_v32 }
  0xc2   : > { %1096 = vst.msk [vmem:[%s1389_s22 + $0x32] sm:$0x3] %vm1070_vm1, %v837_v33 }
  0xc3   : > { %v860_v34 = vpop.f32.mrf.mxu2  ;;  %v883_v35 = vpop.f32.mrf.mxu3 }
  0xc4   : > { %1097 = vst.msk [vmem:[%s1389_s22 + $0x34] sm:$0x3] %vm1070_vm1, %v860_v34 }
  0xc5   : > { %1098 = vst.msk [vmem:[%s1389_s22 + $0x36] sm:$0x3] %vm1070_vm1, %v883_v35 }
  0xc8   : > { %v906_v36 = vpop.f32.mrf.mxu0  ;;  %v929_v37 = vpop.f32.mrf.mxu1 }
  0xc9   : > { %1099 = vst.msk [vmem:[%s1389_s22 + $0x38] sm:$0x3] %vm1070_vm1, %v906_v36 }
  0xca   : > { %1100 = vst.msk [vmem:[%s1389_s22 + $0x3a] sm:$0x3] %vm1070_vm1, %v929_v37 }
  0xcb   : > { %v952_v38 = vpop.f32.mrf.mxu2  ;;  %v975_v39 = vpop.f32.mrf.mxu3 }
  0xcc   : > { %1101 = vst.msk [vmem:[%s1389_s22 + $0x3c] sm:$0x3] %vm1070_vm1, %v952_v38 }
  0xcd   : > { %1102 = vst.msk [vmem:[%s1389_s22 + $0x3e] sm:$0x3] %vm1070_vm1, %v975_v39 }
  0xd0   : > { %v998_v40 = vpop.f32.mrf.mxu0  ;;  %v1021_v41 = vpop.f32.mrf.mxu1 }
  0xd1   : > { %1103 = vst.msk [vmem:[%s1389_s22 + $0x40] sm:$0x3] %vm1070_vm1, %v998_v40 }
  0xd2   : > { %1104 = vst.msk [vmem:[%s1389_s22 + $0x42] sm:$0x3] %vm1070_vm1, %v1021_v41 }
  0xd3   : > { %v1044_v42 = vpop.f32.mrf.mxu2  ;;  %v1067_v43 = vpop.f32.mrf.mxu3 }
  0xd4   : > { %1105 = vst.msk [vmem:[%s1389_s22 + $0x44] sm:$0x3] %vm1070_vm1, %v1044_v42 }
  0xd5   : > { %1106 = vst.msk [vmem:[%s1389_s22 + $0x46] sm:$0x3] %vm1070_vm1, %v1067_v43 }
  0xd6 PF: > { %s12_s9 = sadd.s32 1, %s1235_s9  }
  0xd7   : > { %p9_p4 = scmp.ge.s32.totalorder %s12_s9, 4  }
  0xd9   :  { %11 = sbr.rel (!%p9_p4) target bundleno = 1 (0x1), region = 61 }

// kernel: reverse.1
= control target key start
LH: loop header
LB: loop body
LE: loop exit
PB: predicated region body
PF: predicated region fallthrough
CT: control target
= control target key end

     0   :  { %v104_v10 = vlaneseq  ;;  %v97_v14 = vld [vmem:[#allocation0 + $0x7] ss:$-1 sm:$0xff]  ;;  %v111_v19 = vld [vmem:[#allocation0 + $0x17] ss:$-1 sm:$0xff]  ;;  %s606_s0 = inlined_call_operand.vmem [shape: f32[2,8,16,7], index: 0, kind: input, shape index: {}]   ;;  %s607_s1 = inlined_call_operand.vmem [shape: f32[2,8,16,7], index: 1, kind: output, shape index: {}]  }
   0x1   :  { %v61_v0 = vld [vmem:[%s606_s0] sm:$0xff]  ;;  %v63_v1 = vld [vmem:[%s606_s0 + $0x8] sm:$0xff]  ;;  %v65_v2 = vld [vmem:[%s606_s0 + $0x10] sm:$0xff]  ;;  %v98_v21 = vrot.slane %v97_v14, 1  ;;  %v112_v25 = vrot.slane %v111_v19, 1 }
   0x2   :  { %62 = vst [vmem:[#allocation0 + $0x8] sm:$0xff] %v61_v0  ;;  %v67_v3 = vld [vmem:[%s606_s0 + $0x18] sm:$0xff]  ;;  %v69_v4 = vld [vmem:[%s606_s0 + $0x20] sm:$0xff]  ;;  %v71_v5 = vld [vmem:[%s606_s0 + $0x28] sm:$0xff]  ;;  %v517_v17 = vshrl.u32 %v104_v10, 7 }
   0x3   :  { %64 = vst [vmem:[#allocation0 + $0x18] sm:$0xff] %v63_v1  ;;  %v73_v6 = vld [vmem:[%s606_s0 + $0x30] sm:$0xff]  ;;  %v75_v7 = vld [vmem:[%s606_s0 + $0x38] sm:$0xff]  ;;  %v77_v8 = vld [vmem:[%s606_s0 + $0x40] sm:$0xff] }
   0x4   :  { %66 = vst [vmem:[#allocation0 + $0x28] sm:$0xff] %v65_v2  ;;  %v79_v9 = vld [vmem:[%s606_s0 + $0x48] sm:$0xff]  ;;  %v81_v11 = vld [vmem:[%s606_s0 + $0x50] sm:$0xff]  ;;  %v83_v12 = vld [vmem:[%s606_s0 + $0x58] sm:$0xff]  ;;  %vm106_vm0 = vcmp.lt.s32.totalorder %v517_v17, 7 }
   0x5   :  { %68 = vst [vmem:[#allocation0 + $0x38] sm:$0xff] %v67_v3  ;;  %v85_v13 = vld [vmem:[%s606_s0 + $0x60] sm:$0xff]  ;;  %v87_v15 = vld [vmem:[%s606_s0 + $0x68] sm:$0xff]  ;;  %v89_v18 = vld [vmem:[%s606_s0 + $0x70] sm:$0xff] }
   0x6   :  { %70 = vst [vmem:[#allocation0 + $0x48] sm:$0xff] %v69_v4  ;;  %v91_v20 = vld [vmem:[%s606_s0 + $0x78] sm:$0xff]  ;;  %v125_v24 = vld [vmem:[#allocation0 + $0x27] ss:$-1 sm:$0xff]  ;;  %v139_v28 = vld [vmem:[#allocation0 + $0x37] ss:$-1 sm:$0xff] }
   0x7   :  { %72 = vst [vmem:[#allocation0 + $0x58] sm:$0xff] %v71_v5  ;;  %v126_v29 = vrot.slane %v125_v24, 1  ;;  %v153_v32 = vld [vmem:[#allocation0 + $0x47] ss:$-1 sm:$0xff]  ;;  %v140_v33 = vrot.slane %v139_v28, 1 }
   0x8   :  { %74 = vst [vmem:[#allocation0 + $0x68] sm:$0xff] %v73_v6  ;;  %v167_v36 = vld [vmem:[#allocation0 + $0x57] ss:$-1 sm:$0xff]  ;;  %v154_v37 = vrot.slane %v153_v32, 1  ;;  %v181_v40 = vld [vmem:[#allocation0 + $0x67] ss:$-1 sm:$0xff] }
   0x9   :  { %76 = vst [vmem:[#allocation0 + $0x78] sm:$0xff] %v75_v7  ;;  %v102_v16 = vld [vmem:[#allocation0 + $0xf] ss:$-1 sm:$0xff]  ;;  %v168_v41 = vrot.slane %v167_v36, 1  ;;  %v195_v44 = vld [vmem:[#allocation0 + $0x77] ss:$-1 sm:$0xff] }
   0xa   :  { %78 = vst [vmem:[#allocation0 + $0x88] sm:$0xff] %v77_v8  ;;  %v116_v22 = vld [vmem:[#allocation0 + $0x1f] ss:$-1 sm:$0xff]  ;;  %v103_v23 = vrot.slane %v102_v16, 1  ;;  %v182_v45 = vrot.slane %v181_v40, 1  ;;  %v196_v49 = vrot.slane %v195_v44, 1 }
   0xb   :  { %80 = vst [vmem:[#allocation0 + $0x98] sm:$0xff] %v79_v9  ;;  %v130_v26 = vld [vmem:[#allocation0 + $0x2f] ss:$-1 sm:$0xff]  ;;  %v117_v27 = vrot.slane %v116_v22, 1  ;;  %v209_v48 = vld [vmem:[#allocation0 + $0x87] ss:$-1 sm:$0xff] }
   0xc   :  { %82 = vst [vmem:[#allocation0 + $0xa8] sm:$0xff] %v81_v11  ;;  %v144_v30 = vld [vmem:[#allocation0 + $0x3f] ss:$-1 sm:$0xff]  ;;  %v131_v31 = vrot.slane %v130_v26, 1  ;;  %v223_v52 = vld [vmem:[#allocation0 + $0x97] ss:$-1 sm:$0xff] }
   0xd   :  { %84 = vst [vmem:[#allocation0 + $0xb8] sm:$0xff] %v83_v12  ;;  %v158_v34 = vld [vmem:[#allocation0 + $0x4f] ss:$-1 sm:$0xff]  ;;  %v145_v35 = vrot.slane %v144_v30, 1  ;;  %v210_v53 = vrot.slane %v209_v48, 1  ;;  %v224_v57 = vrot.slane %v223_v52, 1 }
   0xe   :  { %86 = vst [vmem:[#allocation0 + $0xc8] sm:$0xff] %v85_v13  ;;  %v172_v38 = vld [vmem:[#allocation0 + $0x5f] ss:$-1 sm:$0xff]  ;;  %v159_v39 = vrot.slane %v158_v34, 1  ;;  %v237_v56 = vld [vmem:[#allocation0 + $0xa7] ss:$-1 sm:$0xff] }
   0xf   :  { %88 = vst [vmem:[#allocation0 + $0xd8] sm:$0xff] %v87_v15  ;;  %v186_v42 = vld [vmem:[#allocation0 + $0x6f] ss:$-1 sm:$0xff]  ;;  %v173_v43 = vrot.slane %v172_v38, 1  ;;  %v251_v60 = vld [vmem:[#allocation0 + $0xb7] ss:$-1 sm:$0xff] }
  0x10   :  { %90 = vst [vmem:[#allocation0 + $0xe8] sm:$0xff] %v89_v18  ;;  %v200_v46 = vld [vmem:[#allocation0 + $0x7f] ss:$-1 sm:$0xff]  ;;  %v187_v47 = vrot.slane %v186_v42, 1  ;;  %v238_v61 = vrot.slane %v237_v56, 1  ;;  %v252_v1 = vrot.slane %v251_v60, 1 }
  0x11   :  { %92 = vst [vmem:[#allocation0 + $0xf8] sm:$0xff] %v91_v20  ;;  %v214_v50 = vld [vmem:[#allocation0 + $0x8f] ss:$-1 sm:$0xff]  ;;  %v201_v51 = vrot.slane %v200_v46, 1  ;;  %v265_v0 = vld [vmem:[#allocation0 + $0xc7] ss:$-1 sm:$0xff] }
  0x12   :  { %99 = vst [vmem:[#allocation1] sm:$0xff] %v98_v21  ;;  %v228_v54 = vld [vmem:[#allocation0 + $0x9f] ss:$-1 sm:$0xff]  ;;  %v215_v55 = vrot.slane %v214_v50, 1  ;;  %v279_v4 = vld [vmem:[#allocation0 + $0xd7] ss:$-1 sm:$0xff] }
  0x13   :  { %107 = vst.msk [vmem:[#allocation1] sm:$0xff] %vm106_vm0, %v103_v23  ;;  %v242_v58 = vld [vmem:[#allocation0 + $0xaf] ss:$-1 sm:$0xff]  ;;  %v229_v59 = vrot.slane %v228_v54, 1  ;;  %v266_v5 = vrot.slane %v265_v0, 1  ;;  %v280_v9 = vrot.slane %v279_v4, 1 }
  0x14   :  { %113 = vst [vmem:[#allocation1 + $0x8] sm:$0xff] %v112_v25  ;;  %v256_v62 = vld [vmem:[#allocation0 + $0xbf] ss:$-1 sm:$0xff]  ;;  %v243_v63 = vrot.slane %v242_v58, 1  ;;  %v293_v8 = vld [vmem:[#allocation0 + $0xe7] ss:$-1 sm:$0xff] }
  0x15   :  { %121 = vst.msk [vmem:[#allocation1 + $0x8] sm:$0xff] %vm106_vm0, %v117_v27  ;;  %v270_v2 = vld [vmem:[#allocation0 + $0xcf] ss:$-1 sm:$0xff]  ;;  %v257_v3 = vrot.slane %v256_v62, 1  ;;  %v307_v12 = vld [vmem:[#allocation0 + $0xf7] ss:$-1 sm:$0xff] }
  0x16   :  { %127 = vst [vmem:[#allocation1 + $0x10] sm:$0xff] %v126_v29  ;;  %v284_v6 = vld [vmem:[#allocation0 + $0xdf] ss:$-1 sm:$0xff]  ;;  %v271_v7 = vrot.slane %v270_v2, 1  ;;  %v294_v13 = vrot.slane %v293_v8, 1  ;;  %v308_v16 = vrot.slane %v307_v12, 1 }
  0x17   :  { %135 = vst.msk [vmem:[#allocation1 + $0x10] sm:$0xff] %vm106_vm0, %v131_v31  ;;  %v298_v10 = vld [vmem:[#allocation0 + $0xef] ss:$-1 sm:$0xff]  ;;  %v285_v11 = vrot.slane %v284_v6, 1 }
  0x18   :  { %141 = vst [vmem:[#allocation1 + $0x18] sm:$0xff] %v140_v33  ;;  %v312_v14 = vld [vmem:[#allocation0 + $0xff] ss:$-1 sm:$0xff]  ;;  %v299_v15 = vrot.slane %v298_v10, 1 }
  0x19   :  { %149 = vst.msk [vmem:[#allocation1 + $0x18] sm:$0xff] %vm106_vm0, %v145_v35  ;;  %v313_v18 = vrot.slane %v312_v14, 1 }
  0x1a   :  { %155 = vst [vmem:[#allocation1 + $0x20] sm:$0xff] %v154_v37  ;;  %v376_v19 = vld [vmem:[#allocation1] sm:$0xff] }
  0x1b   :  { %163 = vst.msk [vmem:[#allocation1 + $0x20] sm:$0xff] %vm106_vm0, %v159_v39 }
  0x1c   :  { %169 = vst [vmem:[#allocation1 + $0x28] sm:$0xff] %v168_v41  ;;  %v378_v20 = vld [vmem:[#allocation1 + $0x8] sm:$0xff] }
  0x1d   :  { %177 = vst.msk [vmem:[#allocation1 + $0x28] sm:$0xff] %vm106_vm0, %v173_v43 }
  0x1e   :  { %183 = vst [vmem:[#allocation1 + $0x30] sm:$0xff] %v182_v45  ;;  %v380_v17 = vld [vmem:[#allocation1 + $0x10] sm:$0xff] }
  0x1f   :  { %191 = vst.msk [vmem:[#allocation1 + $0x30] sm:$0xff] %vm106_vm0, %v187_v47 }
  0x20   :  { %197 = vst [vmem:[#allocation1 + $0x38] sm:$0xff] %v196_v49  ;;  %v382_v21 = vld [vmem:[#allocation1 + $0x18] sm:$0xff] }
  0x21   :  { %205 = vst.msk [vmem:[#allocation1 + $0x38] sm:$0xff] %vm106_vm0, %v201_v51 }
  0x22   :  { %211 = vst [vmem:[#allocation1 + $0x40] sm:$0xff] %v210_v53  ;;  %v384_v22 = vld [vmem:[#allocation1 + $0x20] sm:$0xff] }
  0x23   :  { %219 = vst.msk [vmem:[#allocation1 + $0x40] sm:$0xff] %vm106_vm0, %v215_v55 }
  0x24   :  { %225 = vst [vmem:[#allocation1 + $0x48] sm:$0xff] %v224_v57  ;;  %v386_v23 = vld [vmem:[#allocation1 + $0x28] sm:$0xff] }
  0x25   :  { %233 = vst.msk [vmem:[#allocation1 + $0x48] sm:$0xff] %vm106_vm0, %v229_v59 }
  0x26   :  { %239 = vst [vmem:[#allocation1 + $0x50] sm:$0xff] %v238_v61  ;;  %v388_v24 = vld [vmem:[#allocation1 + $0x30] sm:$0xff] }
  0x27   :  { %247 = vst.msk [vmem:[#allocation1 + $0x50] sm:$0xff] %vm106_vm0, %v243_v63 }
  0x28   :  { %253 = vst [vmem:[#allocation1 + $0x58] sm:$0xff] %v252_v1  ;;  %v390_v25 = vld [vmem:[#allocation1 + $0x38] sm:$0xff] }
  0x29   :  { %261 = vst.msk [vmem:[#allocation1 + $0x58] sm:$0xff] %vm106_vm0, %v257_v3 }
  0x2a   :  { %267 = vst [vmem:[#allocation1 + $0x60] sm:$0xff] %v266_v5  ;;  %v392_v26 = vld [vmem:[#allocation1 + $0x40] sm:$0xff] }
  0x2b   :  { %275 = vst.msk [vmem:[#allocation1 + $0x60] sm:$0xff] %vm106_vm0, %v271_v7 }
  0x2c   :  { %281 = vst [vmem:[#allocation1 + $0x68] sm:$0xff] %v280_v9  ;;  %v394_v27 = vld [vmem:[#allocation1 + $0x48] sm:$0xff] }
  0x2d   :  { %289 = vst.msk [vmem:[#allocation1 + $0x68] sm:$0xff] %vm106_vm0, %v285_v11 }
  0x2e   :  { %295 = vst [vmem:[#allocation1 + $0x70] sm:$0xff] %v294_v13  ;;  %v396_v28 = vld [vmem:[#allocation1 + $0x50] sm:$0xff] }
  0x2f   :  { %303 = vst.msk [vmem:[#allocation1 + $0x70] sm:$0xff] %vm106_vm0, %v299_v15 }
  0x30   :  { %309 = vst [vmem:[#allocation1 + $0x78] sm:$0xff] %v308_v16  ;;  %v398_v29 = vld [vmem:[#allocation1 + $0x58] sm:$0xff] }
  0x31   :  { %317 = vst.msk [vmem:[#allocation1 + $0x78] sm:$0xff] %vm106_vm0, %v313_v18 }
  0x32   :  { %377 = vst [vmem:[%s607_s1] sm:$0xff] %v376_v19  ;;  %v400_v30 = vld [vmem:[#allocation1 + $0x60] sm:$0xff] }
  0x33   :  { %379 = vst [vmem:[%s607_s1 + $0x8] sm:$0xff] %v378_v20 }
  0x34   :  { %381 = vst [vmem:[%s607_s1 + $0x10] sm:$0xff] %v380_v17  ;;  %v402_v31 = vld [vmem:[#allocation1 + $0x68] sm:$0xff] }
  0x35   :  { %383 = vst [vmem:[%s607_s1 + $0x18] sm:$0xff] %v382_v21 }
  0x36   :  { %385 = vst [vmem:[%s607_s1 + $0x20] sm:$0xff] %v384_v22  ;;  %v404_v32 = vld [vmem:[#allocation1 + $0x70] sm:$0xff] }
  0x37   :  { %387 = vst [vmem:[%s607_s1 + $0x28] sm:$0xff] %v386_v23 }
  0x38   :  { %389 = vst [vmem:[%s607_s1 + $0x30] sm:$0xff] %v388_v24  ;;  %v406_v33 = vld [vmem:[#allocation1 + $0x78] sm:$0xff] }
  0x39   :  { %391 = vst [vmem:[%s607_s1 + $0x38] sm:$0xff] %v390_v25 }
  0x3a   :  { %393 = vst [vmem:[%s607_s1 + $0x40] sm:$0xff] %v392_v26 }
  0x3b   :  { %395 = vst [vmem:[%s607_s1 + $0x48] sm:$0xff] %v394_v27 }
  0x3c   :  { %397 = vst [vmem:[%s607_s1 + $0x50] sm:$0xff] %v396_v28 }
  0x3d   :  { %399 = vst [vmem:[%s607_s1 + $0x58] sm:$0xff] %v398_v29 }
  0x3e   :  { %401 = vst [vmem:[%s607_s1 + $0x60] sm:$0xff] %v400_v30 }
  0x3f   :  { %403 = vst [vmem:[%s607_s1 + $0x68] sm:$0xff] %v402_v31 }
  0x40   :  { %405 = vst [vmem:[%s607_s1 + $0x70] sm:$0xff] %v404_v32 }
  0x41   :  { %407 = vst [vmem:[%s607_s1 + $0x78] sm:$0xff] %v406_v33 }

</bundles_post_ra>
